<compile_context>
chip_gen: v5e
topology: v5e:2x2
jax: 0.10.0
libtpu: 0.0.40
codegen_flags: <defaults>
</compile_context>

<pallas_src>
import jax
import jax.numpy as jnp
from jax import lax
from jax.experimental import pallas as pl
from jax.experimental.pallas import tpu as pltpu

# ----------------------------------------------------------------------------
# Module config: Up_cat3(in_ch=12, out_ch=8, bilinear=False)
# ----------------------------------------------------------------------------
IN_CH = 12            # channels after cat([x3, x2, up(x1)])
OUT_CH = 8
C1 = IN_CH // 3       # channels of each of x1 / x2 / x3
EPS = 1e-5            # nn.InstanceNorm2d default eps, affine=False


def _round_up(v, m):
    return (v + m - 1) // m * m


# ----------------------------------------------------------------------------
# Kernel 1: ConvTranspose2d(C1, C1, 2, stride=2) as ONE flipped-layout matmul
#   w [(kh,kw,co), ci_pad] @ x [ci_pad, N*H1*W1] -> [(kh,kw,co), N*H1*W1]
# ----------------------------------------------------------------------------
def _upconv_kernel(w_ref, x_ref, b_ref, o_ref):
    o_ref[...] = (
        jnp.dot(w_ref[...], x_ref[...], preferred_element_type=jnp.float32)
        + b_ref[...]
    ).astype(o_ref.dtype)


def conv_transpose_2x2_s2(x1_nchw, w_up, b_up):
    """x1: [N, C, H1, W1]; w_up: [C, C, 2, 2] (PyTorch IOHW); b_up: [C].
    Returns the upsampled tensor [N, C, 2*H1, 2*W1] (NCHW)."""
    N, C, H1, W1 = x1_nchw.shape
    NP = N * H1 * W1
    K = _round_up(C, 8)                           # pad contraction dim to 8

    x_r = x1_nchw.astype(jnp.float32).transpose(1, 0, 2, 3).reshape(C, NP)
    x_r = jnp.pad(x_r, ((0, K - C), (0, 0)))
    w_r = w_up.astype(jnp.float32).transpose(2, 3, 1, 0).reshape(4 * C, C)
    w_r = jnp.pad(w_r, ((0, 0), (0, K - C)))
    b_r = jnp.broadcast_to(b_up.astype(jnp.float32), (4, C)).reshape(4 * C, 1)

    y = pl.pallas_call(
        _upconv_kernel,
        out_shape=jax.ShapeDtypeStruct((4 * C, NP), jnp.float32),
        grid=(1,),                                # one step over the whole batch
        in_specs=[
            pl.BlockSpec((4 * C, K), lambda i: (0, 0)),
            pl.BlockSpec((K, NP), lambda i: (0, 0)),
            pl.BlockSpec((4 * C, 1), lambda i: (0, 0)),
        ],
        out_specs=pl.BlockSpec((4 * C, NP), lambda i: (0, 0)),
        compiler_params=pltpu.CompilerParams(
            dimension_semantics=("arbitrary",),
            vmem_limit_bytes=32 << 20,
        ),
    )(w_r, x_r, b_r)

    # (kh, kw) phase interleave -> [N, C, 2H1, 2W1].  Tiny tensor; XLA fuses it
    # with the concat/halo-pad frame build below.
    y = y.reshape(2, 2, C, N, H1, W1).transpose(3, 2, 4, 0, 5, 1)
    return y.reshape(N, C, 2 * H1, 2 * W1)


# ----------------------------------------------------------------------------
# Kernel 2: fused DoubleConv (conv3x3 + InstanceNorm + ReLU, twice), flipped
# layout + im2col, one sample per grid step.
# ----------------------------------------------------------------------------
def _make_doubleconv_kernel(rows, n_valid, offsets, cin_p, cmid, cout,
                            front, delta, halo_tail):
    inv_n = 1.0 / float(n_valid)

    def kernel(x_ref, mask_ref, w1_ref, b1_ref, w2_ref, b2_ref, o_ref,
               col1_ref, frame2_ref, col2_ref):
        # x_ref:      [cin_p, FR1]    flattened halo-padded input frame
        # mask_ref:   [1, rows]       1.0 at real pixels, 0.0 at 2 halo cols/row
        # w1_ref:     [cmid, 9*cin_p] b1_ref: [cmid, 1]
        # w2_ref:     [cout, 9*cmid]  b2_ref: [cout, 1]
        # o_ref:      [cout, rows]    lane-dense output slab
        # col1_ref:   [9*cin_p, rows] im2col staging for conv1
        # frame2_ref: [cmid, FR2]     h re-framed with a zero halo for conv2
        # col2_ref:   [9*cmid, rows]  im2col staging for conv2
        mask = mask_ref[...]

        # ---- conv1: im2col (9 shifted lane-slices) + one K=9*cin_p matmul ----
        for t, off in enumerate(offsets):
            col1_ref[t * cin_p:(t + 1) * cin_p, :] = x_ref[:, off:off + rows]
        acc = jnp.dot(w1_ref[...], col1_ref[...],
                      preferred_element_type=jnp.float32) + b1_ref[...]

        # ---- InstanceNorm2d (stats over the H*W real pixels) + ReLU ----
        mean = jnp.sum(acc * mask, axis=1, keepdims=True) * inv_n
        cen = acc - mean
        var = jnp.sum(cen * cen * mask, axis=1, keepdims=True) * inv_n
        h = jnp.maximum(cen * lax.rsqrt(var + EPS), 0.0) * mask

        # ---- re-frame h with a zero halo for conv2 ----
        # Only the two small halo bands are cleared; the interior is fully
        # rewritten with the masked h.  Cleared every step (not just step 0)
        # so it stays correct if the "parallel" batch axis is core-sharded.
        frame2_ref[:, :front] = jnp.zeros((cmid, front), jnp.float32)
        frame2_ref[:, front + rows:] = jnp.zeros((cmid, halo_tail), jnp.float32)
        frame2_ref[:, front:front + rows] = h

        # ---- conv2: im2col + one K=9*cmid matmul ----
        for t, off in enumerate(offsets):
            col2_ref[t * cmid:(t + 1) * cmid, :] = (
                frame2_ref[:, delta + off:delta + off + rows])
        acc2 = jnp.dot(w2_ref[...], col2_ref[...],
                       preferred_element_type=jnp.float32) + b2_ref[...]

        # ---- InstanceNorm2d + ReLU ----
        mean2 = jnp.sum(acc2 * mask, axis=1, keepdims=True) * inv_n
        cen2 = acc2 - mean2
        var2 = jnp.sum(cen2 * cen2 * mask, axis=1, keepdims=True) * inv_n
        o_ref[...] = jnp.maximum(cen2 * lax.rsqrt(var2 + EPS), 0.0).astype(o_ref.dtype)

    return kernel


def double_conv(x_nchw, w1, b1, w2, b2):
    """x_nchw: [N, Cin, H, W]; w1: [Cmid, Cin, 3, 3]; w2: [Cout, Cmid, 3, 3].
    Returns [N, Cout, H, W] (NCHW)."""
    N, Cin, H, W = x_nchw.shape
    Cmid, Cout = w1.shape[0], w2.shape[0]
    CinP = _round_up(Cin, 8)             # 8-aligned im2col sublane blocks

    Wpp = W + 2                          # halo-padded row stride (lane axis)
    rows = H * Wpp                       # flattened output rows per sample
    FR1 = (H + 3) * Wpp                  # +1 extra zero row so tap (2,2) stays in range
    offsets = tuple(dy * Wpp + dx for dy in range(3) for dx in range(3))
    front = _round_up(Wpp + 1, 128)      # lane-aligned start of conv2's interior
    delta = front - (Wpp + 1)
    halo_tail = Wpp + 1                  # right halo of last row + read bit of bottom pad
    FR2 = front + rows + halo_tail

    # flattened, halo-padded, channel-padded frame (one fused XLA pad/reshape)
    xf = jnp.pad(x_nchw.astype(jnp.float32),
                 ((0, 0), (0, CinP - Cin), (1, 2), (1, 1))).reshape(N, CinP, FR1)

    # lane-dense validity mask: row r = y*Wpp + x is real iff x < W
    mask = ((jnp.arange(rows, dtype=jnp.int32) % Wpp) < W
            ).astype(jnp.float32).reshape(1, rows)

    # weights in tap-major im2col layout [Cout, 9*Cpad]
    w1_f = jnp.pad(w1.astype(jnp.float32), ((0, 0), (0, CinP - Cin), (0, 0), (0, 0)))
    w1_f = w1_f.transpose(0, 2, 3, 1).reshape(Cmid, 9 * CinP)
    w2_f = w2.astype(jnp.float32).transpose(0, 2, 3, 1).reshape(Cout, 9 * Cmid)
    b1_r = b1.astype(jnp.float32).reshape(Cmid, 1)
    b2_r = b2.astype(jnp.float32).reshape(Cout, 1)

    kernel = _make_doubleconv_kernel(rows, H * W, offsets, CinP, Cmid, Cout,
                                     front, delta, halo_tail)

    out = pl.pallas_call(
        kernel,
        out_shape=jax.ShapeDtypeStruct((N, Cout, rows), jnp.float32),
        grid=(N,),
        in_specs=[
            pl.BlockSpec((None, CinP, FR1), lambda n: (n, 0, 0)),
            pl.BlockSpec((1, rows), lambda n: (0, 0)),
            pl.BlockSpec((Cmid, 9 * CinP), lambda n: (0, 0)),
            pl.BlockSpec((Cmid, 1), lambda n: (0, 0)),
            pl.BlockSpec((Cout, 9 * Cmid), lambda n: (0, 0)),
            pl.BlockSpec((Cout, 1), lambda n: (0, 0)),
        ],
        out_specs=pl.BlockSpec((None, Cout, rows), lambda n: (n, 0, 0)),
        scratch_shapes=[
            pltpu.VMEM((9 * CinP, rows), jnp.float32),   # col1
            pltpu.VMEM((Cmid, FR2), jnp.float32),        # frame2
            pltpu.VMEM((9 * Cmid, rows), jnp.float32),   # col2
        ],
        compiler_params=pltpu.CompilerParams(
            dimension_semantics=("parallel",),
            vmem_limit_bytes=32 << 20,
        ),
    )(xf, mask, w1_f, b1_r, w2_f, b2_r)

    # un-flatten and crop the 2 halo columns -> NCHW (cheap XLA slice)
    return out.reshape(N, Cout, H, Wpp)[:, :, :, :W]


# ----------------------------------------------------------------------------
# Full Up_cat3 forward
# ----------------------------------------------------------------------------
def up_cat3_forward(x1, x2, x3, params):
    w_up, b_up, w1, b1, w2, b2 = params
    x1_up = conv_transpose_2x2_s2(x1, w_up, b_up)               # [N, C1, H, W]
    # torch.cat([x3, x2, x1], dim=1): inputs are already NCHW, which is the
    # channels-on-sublane layout the fused kernel wants -> no transposes.
    xcat = jnp.concatenate([x3.astype(jnp.float32),
                            x2.astype(jnp.float32), x1_up], axis=1)
    return double_conv(xcat, w1, b1, w2, b2)


# ----------------------------------------------------------------------------
# Pure-JAX reference (independent math via lax convs)
# ----------------------------------------------------------------------------
def _instance_norm_ref(x):
    mean = jnp.mean(x, axis=(2, 3), keepdims=True)
    var = jnp.mean((x - mean) ** 2, axis=(2, 3), keepdims=True)
    return (x - mean) * lax.rsqrt(var + EPS)


def reference_forward(x1, x2, x3, params):
    w_up, b_up, w1, b1, w2, b2 = params
    # ConvTranspose2d(k=2, s=2, p=0) == conv with lhs_dilation=2, pad=1, flipped kernel
    x1_up = lax.conv_general_dilated(
        x1, jnp.flip(w_up, (2, 3)).transpose(1, 0, 2, 3),
        window_strides=(1, 1), padding=((1, 1), (1, 1)), lhs_dilation=(2, 2),
        dimension_numbers=("NCHW", "OIHW", "NCHW"),
        precision=lax.Precision.HIGHEST,
    ) + b_up[None, :, None, None]
    x = jnp.concatenate([x3, x2, x1_up], axis=1)

    def conv3x3(v, w, b):
        return lax.conv_general_dilated(
            v, w, window_strides=(1, 1), padding=((1, 1), (1, 1)),
            dimension_numbers=("NCHW", "OIHW", "NCHW"),
            precision=lax.Precision.HIGHEST,
        ) + b[None, :, None, None]

    h = jnp.maximum(_instance_norm_ref(conv3x3(x, w1, b1)), 0.0)
    return jnp.maximum(_instance_norm_ref(conv3x3(h, w2, b2)), 0.0)


if __name__ == "__main__":
    key = jax.random.PRNGKey(0)
    ks = jax.random.split(key, 9)
    N, H1, W1 = 2, 8, 8
    H, W = 2 * H1, 2 * W1

    x1 = jax.random.normal(ks[0], (N, C1, H1, W1), jnp.float32)
    x2 = jax.random.normal(ks[1], (N, C1, H, W), jnp.float32)
    x3 = jax.random.normal(ks[2], (N, C1, H, W), jnp.float32)

    def uinit(k, shape, fan_in):
        lim = 1.0 / jnp.sqrt(jnp.float32(fan_in))
        return jax.random.uniform(k, shape, jnp.float32, -lim, lim)

    # ConvTranspose2d(C1, C1, 2, stride=2): weight [in, out, kh, kw]
    w_up = uinit(ks[3], (C1, C1, 2, 2), C1 * 4)
    b_up = uinit(ks[4], (C1,), C1 * 4)
    # DoubleConv: Conv2d(IN_CH, OUT_CH, 3) and Conv2d(OUT_CH, OUT_CH, 3)
    w1 = uinit(ks[5], (OUT_CH, IN_CH, 3, 3), IN_CH * 9)
    b1 = uinit(ks[6], (OUT_CH,), IN_CH * 9)
    w2 = uinit(ks[7], (OUT_CH, OUT_CH, 3, 3), OUT_CH * 9)
    b2 = uinit(ks[8], (OUT_CH,), OUT_CH * 9)
    params = (w_up, b_up, w1, b1, w2, b2)

    out = jax.jit(up_cat3_forward)(x1, x2, x3, params)
    out = jax.block_until_ready(out)

    ref = reference_forward(x1, x2, x3, params)
    assert out.shape == (N, OUT_CH, H, W), out.shape
    max_err = float(jnp.max(jnp.abs(out - ref)))
    # Tolerance covers the MXU's default bf16-pass handling of f32 matmuls
    # (InstanceNorm over few pixels amplifies it); real indexing/layout bugs
    # would show O(1) errors.
    assert jnp.allclose(out, ref, atol=3e-2, rtol=3e-2), f"max abs err {max_err}"

    print("KERNEL_OK")
</pallas_src>

<mosaic_0001>
module attributes {stable_mosaic.version = 11 : i64} {
  func.func @_upconv_kernel(%arg0: i32, %arg1: memref<16x8xf32, #tpu.memory_space<vmem>>, %arg2: memref<8x128xf32, #tpu.memory_space<vmem>>, %arg3: memref<16x1xf32, #tpu.memory_space<vmem>>, %arg4: memref<16x128xf32, #tpu.memory_space<vmem>>) attributes {dimension_semantics = [#tpu.dimension_semantics<arbitrary>], iteration_bounds = array<i64: 1>, scalar_prefetch = 0 : i64, scratch_operands = 0 : i64, tpu.core_type = #tpu.core_type<tc>, window_params = [{pipeline_mode = #tpu.pipeline_mode<synchronous>, transform_indices = @transform_0, window_bounds = array<i64: 16, 8>}, {pipeline_mode = #tpu.pipeline_mode<synchronous>, transform_indices = @transform_1, window_bounds = array<i64: 8, 128>}, {pipeline_mode = #tpu.pipeline_mode<synchronous>, transform_indices = @transform_2, window_bounds = array<i64: 16, 1>}, {pipeline_mode = #tpu.pipeline_mode<synchronous>, transform_indices = @transform_3, window_bounds = array<i64: 16, 128>}]} {
    %c0 = arith.constant 0 : index
    %c0_0 = arith.constant 0 : index
    %0 = vector.load %arg1[%c0, %c0_0] : memref<16x8xf32, #tpu.memory_space<vmem>>, vector<16x8xf32>
    %c0_1 = arith.constant 0 : index
    %c0_2 = arith.constant 0 : index
    %1 = vector.load %arg2[%c0_1, %c0_2] : memref<8x128xf32, #tpu.memory_space<vmem>>, vector<8x128xf32>
    %cst = arith.constant dense<0.000000e+00> : vector<16x128xf32>
    %2 = tpu.matmul %0, %1, %cst {dimension_numbers = #tpu.dot_dimension_numbers<[1], [0], [0], [1], [0, 0, 1, 1], [], []>} : vector<16x8xf32>, vector<8x128xf32>, vector<16x128xf32> -> vector<16x128xf32>
    %c0_3 = arith.constant 0 : index
    %c0_4 = arith.constant 0 : index
    %3 = vector.load %arg3[%c0_3, %c0_4] : memref<16x1xf32, #tpu.memory_space<vmem>>, vector<16x1xf32>
    %4 = vector.broadcast %3 : vector<16x1xf32> to vector<16x128xf32>
    %5 = arith.addf %2, %4 : vector<16x128xf32>
    %c0_5 = arith.constant 0 : index
    %c0_6 = arith.constant 0 : index
    %6 = vector.load %arg4[%c0_5, %c0_6] : memref<16x128xf32, #tpu.memory_space<vmem>>, vector<16x128xf32>
    tpu.vector_store %arg4[%c0_5, %c0_6], %5 {strides = array<i32>} : memref<16x128xf32, #tpu.memory_space<vmem>>, vector<16x128xf32>,
    return
  }
  func.func @transform_0(%arg0: i32) -> (i32, i32) {
    %c0_i32 = arith.constant 0 : i32
    %c0_i32_0 = arith.constant 0 : i32
    %c0_i32_1 = arith.constant 0 : i32
    return %c0_i32, %c0_i32_0 : i32, i32
  }
  func.func @transform_1(%arg0: i32) -> (i32, i32) {
    %c0_i32 = arith.constant 0 : i32
    %c0_i32_0 = arith.constant 0 : i32
    %c0_i32_1 = arith.constant 0 : i32
    return %c0_i32, %c0_i32_0 : i32, i32
  }
  func.func @transform_2(%arg0: i32) -> (i32, i32) {
    %c0_i32 = arith.constant 0 : i32
    %c0_i32_0 = arith.constant 0 : i32
    %c0_i32_1 = arith.constant 0 : i32
    return %c0_i32, %c0_i32_0 : i32, i32
  }
  func.func @transform_3(%arg0: i32) -> (i32, i32) {
    %c0_i32 = arith.constant 0 : i32
    %c0_i32_0 = arith.constant 0 : i32
    %c0_i32_1 = arith.constant 0 : i32
    return %c0_i32, %c0_i32_0 : i32, i32
  }
}

module attributes {stable_mosaic.version = 11 : i64} {
  func.func @kernel(%arg0: i32, %arg1: memref<1x16x342xf32, #tpu.memory_space<vmem>>, %arg2: memref<1x288xf32, #tpu.memory_space<vmem>>, %arg3: memref<8x144xf32, #tpu.memory_space<vmem>>, %arg4: memref<8x1xf32, #tpu.memory_space<vmem>>, %arg5: memref<8x72xf32, #tpu.memory_space<vmem>>, %arg6: memref<8x1xf32, #tpu.memory_space<vmem>>, %arg7: memref<1x8x288xf32, #tpu.memory_space<vmem>>, %arg8: memref<144x288xf32, #tpu.memory_space<vmem>>, %arg9: memref<8x435xf32, #tpu.memory_space<vmem>>, %arg10: memref<72x288xf32, #tpu.memory_space<vmem>>) attributes {dimension_semantics = [#tpu.dimension_semantics<parallel>], iteration_bounds = array<i64: 2>, scalar_prefetch = 0 : i64, scratch_operands = 3 : i64, tpu.core_type = #tpu.core_type<tc>, window_params = [{transform_indices = @transform_0, window_bounds = array<i64: 1, 16, 342>}, {pipeline_mode = #tpu.pipeline_mode<synchronous>, transform_indices = @transform_1, window_bounds = array<i64: 1, 288>}, {pipeline_mode = #tpu.pipeline_mode<synchronous>, transform_indices = @transform_2, window_bounds = array<i64: 8, 144>}, {pipeline_mode = #tpu.pipeline_mode<synchronous>, transform_indices = @transform_3, window_bounds = array<i64: 8, 1>}, {pipeline_mode = #tpu.pipeline_mode<synchronous>, transform_indices = @transform_4, window_bounds = array<i64: 8, 72>}, {pipeline_mode = #tpu.pipeline_mode<synchronous>, transform_indices = @transform_5, window_bounds = array<i64: 8, 1>}, {transform_indices = @transform_6, window_bounds = array<i64: 1, 8, 288>}]} {
    %c0 = arith.constant 0 : index
    %c0_0 = arith.constant 0 : index
    %0 = vector.load %arg2[%c0, %c0_0] : memref<1x288xf32, #tpu.memory_space<vmem>>, vector<1x288xf32>
    %c0_1 = arith.constant 0 : index
    %c0_2 = arith.constant 0 : index
    %c0_3 = arith.constant 0 : index
    %1 = vector.load %arg1[%c0_1, %c0_2, %c0_3] : memref<1x16x342xf32, #tpu.memory_space<vmem>>, vector<1x16x288xf32>
    %2 = vector.shape_cast %1 : vector<1x16x288xf32> to vector<16x288xf32>
    %c0_4 = arith.constant 0 : index
    %c0_5 = arith.constant 0 : index
    %3 = vector.load %arg8[%c0_4, %c0_5] : memref<144x288xf32, #tpu.memory_space<vmem>>, vector<16x288xf32>
    tpu.vector_store %arg8[%c0_4, %c0_5], %2 {strides = array<i32>} : memref<144x288xf32, #tpu.memory_space<vmem>>, vector<16x288xf32>,
    %c0_6 = arith.constant 0 : index
    %c0_7 = arith.constant 0 : index
    %c1 = arith.constant 1 : index
    %4 = vector.load %arg1[%c0_6, %c0_7, %c1] : memref<1x16x342xf32, #tpu.memory_space<vmem>>, vector<1x16x288xf32>
    %5 = vector.shape_cast %4 : vector<1x16x288xf32> to vector<16x288xf32>
    %c16 = arith.constant 16 : index
    %c0_8 = arith.constant 0 : index
    %6 = vector.load %arg8[%c16, %c0_8] : memref<144x288xf32, #tpu.memory_space<vmem>>, vector<16x288xf32>
    tpu.vector_store %arg8[%c16, %c0_8], %5 {strides = array<i32>} : memref<144x288xf32, #tpu.memory_space<vmem>>, vector<16x288xf32>,
    %c0_9 = arith.constant 0 : index
    %c0_10 = arith.constant 0 : index
    %c2 = arith.constant 2 : index
    %7 = vector.load %arg1[%c0_9, %c0_10, %c2] : memref<1x16x342xf32, #tpu.memory_space<vmem>>, vector<1x16x288xf32>
    %8 = vector.shape_cast %7 : vector<1x16x288xf32> to vector<16x288xf32>
    %c32 = arith.constant 32 : index
    %c0_11 = arith.constant 0 : index
    %9 = vector.load %arg8[%c32, %c0_11] : memref<144x288xf32, #tpu.memory_space<vmem>>, vector<16x288xf32>
    tpu.vector_store %arg8[%c32, %c0_11], %8 {strides = array<i32>} : memref<144x288xf32, #tpu.memory_space<vmem>>, vector<16x288xf32>,
    %c0_12 = arith.constant 0 : index
    %c0_13 = arith.constant 0 : index
    %c18 = arith.constant 18 : index
    %10 = vector.load %arg1[%c0_12, %c0_13, %c18] : memref<1x16x342xf32, #tpu.memory_space<vmem>>, vector<1x16x288xf32>
    %11 = vector.shape_cast %10 : vector<1x16x288xf32> to vector<16x288xf32>
    %c48 = arith.constant 48 : index
    %c0_14 = arith.constant 0 : index
    %12 = vector.load %arg8[%c48, %c0_14] : memref<144x288xf32, #tpu.memory_space<vmem>>, vector<16x288xf32>
    tpu.vector_store %arg8[%c48, %c0_14], %11 {strides = array<i32>} : memref<144x288xf32, #tpu.memory_space<vmem>>, vector<16x288xf32>,
    %c0_15 = arith.constant 0 : index
    %c0_16 = arith.constant 0 : index
    %c19 = arith.constant 19 : index
    %13 = vector.load %arg1[%c0_15, %c0_16, %c19] : memref<1x16x342xf32, #tpu.memory_space<vmem>>, vector<1x16x288xf32>
    %14 = vector.shape_cast %13 : vector<1x16x288xf32> to vector<16x288xf32>
    %c64 = arith.constant 64 : index
    %c0_17 = arith.constant 0 : index
    %15 = vector.load %arg8[%c64, %c0_17] : memref<144x288xf32, #tpu.memory_space<vmem>>, vector<16x288xf32>
    tpu.vector_store %arg8[%c64, %c0_17], %14 {strides = array<i32>} : memref<144x288xf32, #tpu.memory_space<vmem>>, vector<16x288xf32>,
    %c0_18 = arith.constant 0 : index
    %c0_19 = arith.constant 0 : index
    %c20 = arith.constant 20 : index
    %16 = vector.load %arg1[%c0_18, %c0_19, %c20] : memref<1x16x342xf32, #tpu.memory_space<vmem>>, vector<1x16x288xf32>
    %17 = vector.shape_cast %16 : vector<1x16x288xf32> to vector<16x288xf32>
    %c80 = arith.constant 80 : index
    %c0_20 = arith.constant 0 : index
    %18 = vector.load %arg8[%c80, %c0_20] : memref<144x288xf32, #tpu.memory_space<vmem>>, vector<16x288xf32>
    tpu.vector_store %arg8[%c80, %c0_20], %17 {strides = array<i32>} : memref<144x288xf32, #tpu.memory_space<vmem>>, vector<16x288xf32>,
    %c0_21 = arith.constant 0 : index
    %c0_22 = arith.constant 0 : index
    %c36 = arith.constant 36 : index
    %19 = vector.load %arg1[%c0_21, %c0_22, %c36] : memref<1x16x342xf32, #tpu.memory_space<vmem>>, vector<1x16x288xf32>
    %20 = vector.shape_cast %19 : vector<1x16x288xf32> to vector<16x288xf32>
    %c96 = arith.constant 96 : index
    %c0_23 = arith.constant 0 : index
    %21 = vector.load %arg8[%c96, %c0_23] : memref<144x288xf32, #tpu.memory_space<vmem>>, vector<16x288xf32>
    tpu.vector_store %arg8[%c96, %c0_23], %20 {strides = array<i32>} : memref<144x288xf32, #tpu.memory_space<vmem>>, vector<16x288xf32>,
    %c0_24 = arith.constant 0 : index
    %c0_25 = arith.constant 0 : index
    %c37 = arith.constant 37 : index
    %22 = vector.load %arg1[%c0_24, %c0_25, %c37] : memref<1x16x342xf32, #tpu.memory_space<vmem>>, vector<1x16x288xf32>
    %23 = vector.shape_cast %22 : vector<1x16x288xf32> to vector<16x288xf32>
    %c112 = arith.constant 112 : index
    %c0_26 = arith.constant 0 : index
    %24 = vector.load %arg8[%c112, %c0_26] : memref<144x288xf32, #tpu.memory_space<vmem>>, vector<16x288xf32>
    tpu.vector_store %arg8[%c112, %c0_26], %23 {strides = array<i32>} : memref<144x288xf32, #tpu.memory_space<vmem>>, vector<16x288xf32>,
    %c0_27 = arith.constant 0 : index
    %c0_28 = arith.constant 0 : index
    %c38 = arith.constant 38 : index
    %25 = vector.load %arg1[%c0_27, %c0_28, %c38] : memref<1x16x342xf32, #tpu.memory_space<vmem>>, vector<1x16x288xf32>
    %26 = vector.shape_cast %25 : vector<1x16x288xf32> to vector<16x288xf32>
    %c128 = arith.constant 128 : index
    %c0_29 = arith.constant 0 : index
    %27 = vector.load %arg8[%c128, %c0_29] : memref<144x288xf32, #tpu.memory_space<vmem>>, vector<16x288xf32>
    tpu.vector_store %arg8[%c128, %c0_29], %26 {strides = array<i32>} : memref<144x288xf32, #tpu.memory_space<vmem>>, vector<16x288xf32>,
    %c0_30 = arith.constant 0 : index
    %c0_31 = arith.constant 0 : index
    %28 = vector.load %arg3[%c0_30, %c0_31] : memref<8x144xf32, #tpu.memory_space<vmem>>, vector<8x144xf32>
    %c0_32 = arith.constant 0 : index
    %c0_33 = arith.constant 0 : index
    %29 = vector.load %arg8[%c0_32, %c0_33] : memref<144x288xf32, #tpu.memory_space<vmem>>, vector<144x288xf32>
    %cst = arith.constant dense<0.000000e+00> : vector<8x288xf32>
    %30 = tpu.matmul %28, %29, %cst {dimension_numbers = #tpu.dot_dimension_numbers<[1], [0], [0], [1], [0, 0, 1, 1], [], []>} : vector<8x144xf32>, vector<144x288xf32>, vector<8x288xf32> -> vector<8x288xf32>
    %c0_34 = arith.constant 0 : index
    %c0_35 = arith.constant 0 : index
    %31 = vector.load %arg4[%c0_34, %c0_35] : memref<8x1xf32, #tpu.memory_space<vmem>>, vector<8x1xf32>
    %32 = vector.broadcast %31 : vector<8x1xf32> to vector<8x288xf32>
    %33 = arith.addf %30, %32 : vector<8x288xf32>
    %34 = vector.broadcast %0 : vector<1x288xf32> to vector<8x288xf32>
    %35 = arith.mulf %33, %34 : vector<8x288xf32>
    %cst_36 = arith.constant dense<0.000000e+00> : vector<8xf32>
    %36 = vector.multi_reduction <add>, %35, %cst_36 [1] : vector<8x288xf32> to vector<8xf32>
    %37 = vector.shape_cast %36 : vector<8xf32> to vector<8x1xf32>
    %cst_37 = arith.constant 3.906250e-03 : f32
    %38 = vector.broadcast %cst_37 : f32 to vector<8x1xf32>
    %39 = arith.mulf %37, %38 : vector<8x1xf32>
    %40 = vector.broadcast %39 : vector<8x1xf32> to vector<8x288xf32>
    %41 = arith.subf %33, %40 : vector<8x288xf32>
    %42 = arith.mulf %41, %41 : vector<8x288xf32>
    %43 = vector.broadcast %0 : vector<1x288xf32> to vector<8x288xf32>
    %44 = arith.mulf %42, %43 : vector<8x288xf32>
    %cst_38 = arith.constant dense<0.000000e+00> : vector<8xf32>
    %45 = vector.multi_reduction <add>, %44, %cst_38 [1] : vector<8x288xf32> to vector<8xf32>
    %46 = vector.shape_cast %45 : vector<8xf32> to vector<8x1xf32>
    %cst_39 = arith.constant 3.906250e-03 : f32
    %47 = vector.broadcast %cst_39 : f32 to vector<8x1xf32>
    %48 = arith.mulf %46, %47 : vector<8x1xf32>
    %cst_40 = arith.constant 9.99999974E-6 : f32
    %49 = vector.broadcast %cst_40 : f32 to vector<8x1xf32>
    %50 = arith.addf %48, %49 : vector<8x1xf32>
    %51 = math.rsqrt %50 : vector<8x1xf32>
    %52 = vector.broadcast %51 : vector<8x1xf32> to vector<8x288xf32>
    %53 = arith.mulf %41, %52 : vector<8x288xf32>
    %cst_41 = arith.constant 0.000000e+00 : f32
    %54 = vector.broadcast %cst_41 : f32 to vector<8x288xf32>
    %55 = arith.maximumf %53, %54 : vector<8x288xf32>
    %56 = vector.broadcast %0 : vector<1x288xf32> to vector<8x288xf32>
    %57 = arith.mulf %55, %56 : vector<8x288xf32>
    %cst_42 = arith.constant 0.000000e+00 : f32
    %58 = vector.broadcast %cst_42 : f32 to vector<8x128xf32>
    %c0_43 = arith.constant 0 : index
    %c0_44 = arith.constant 0 : index
    %59 = vector.load %arg9[%c0_43, %c0_44] : memref<8x435xf32, #tpu.memory_space<vmem>>, vector<8x128xf32>
    tpu.vector_store %arg9[%c0_43, %c0_44], %58 {strides = array<i32>} : memref<8x435xf32, #tpu.memory_space<vmem>>, vector<8x128xf32>,
    %cst_45 = arith.constant 0.000000e+00 : f32
    %60 = vector.broadcast %cst_45 : f32 to vector<8x19xf32>
    %c0_46 = arith.constant 0 : index
    %c416 = arith.constant 416 : index
    %61 = vector.load %arg9[%c0_46, %c416] : memref<8x435xf32, #tpu.memory_space<vmem>>, vector<8x19xf32>
    tpu.vector_store %arg9[%c0_46, %c416], %60 {strides = array<i32>} : memref<8x435xf32, #tpu.memory_space<vmem>>, vector<8x19xf32>,
    %c0_47 = arith.constant 0 : index
    %c128_48 = arith.constant 128 : index
    %62 = vector.load %arg9[%c0_47, %c128_48] : memref<8x435xf32, #tpu.memory_space<vmem>>, vector<8x288xf32>
    tpu.vector_store %arg9[%c0_47, %c128_48], %57 {strides = array<i32>} : memref<8x435xf32, #tpu.memory_space<vmem>>, vector<8x288xf32>,
    %c0_49 = arith.constant 0 : index
    %c109 = arith.constant 109 : index
    %63 = vector.load %arg9[%c0_49, %c109] : memref<8x435xf32, #tpu.memory_space<vmem>>, vector<8x288xf32>
    %c0_50 = arith.constant 0 : index
    %c0_51 = arith.constant 0 : index
    %64 = vector.load %arg10[%c0_50, %c0_51] : memref<72x288xf32, #tpu.memory_space<vmem>>, vector<8x288xf32>
    tpu.vector_store %arg10[%c0_50, %c0_51], %63 {strides = array<i32>} : memref<72x288xf32, #tpu.memory_space<vmem>>, vector<8x288xf32>,
    %c0_52 = arith.constant 0 : index
    %c110 = arith.constant 110 : index
    %65 = vector.load %arg9[%c0_52, %c110] : memref<8x435xf32, #tpu.memory_space<vmem>>, vector<8x288xf32>
    %c8 = arith.constant 8 : index
    %c0_53 = arith.constant 0 : index
    %66 = vector.load %arg10[%c8, %c0_53] : memref<72x288xf32, #tpu.memory_space<vmem>>, vector<8x288xf32>
    tpu.vector_store %arg10[%c8, %c0_53], %65 {strides = array<i32>} : memref<72x288xf32, #tpu.memory_space<vmem>>, vector<8x288xf32>,
    %c0_54 = arith.constant 0 : index
    %c111 = arith.constant 111 : index
    %67 = vector.load %arg9[%c0_54, %c111] : memref<8x435xf32, #tpu.memory_space<vmem>>, vector<8x288xf32>
    %c16_55 = arith.constant 16 : index
    %c0_56 = arith.constant 0 : index
    %68 = vector.load %arg10[%c16_55, %c0_56] : memref<72x288xf32, #tpu.memory_space<vmem>>, vector<8x288xf32>
    tpu.vector_store %arg10[%c16_55, %c0_56], %67 {strides = array<i32>} : memref<72x288xf32, #tpu.memory_space<vmem>>, vector<8x288xf32>,
    %c0_57 = arith.constant 0 : index
    %c127 = arith.constant 127 : index
    %69 = vector.load %arg9[%c0_57, %c127] : memref<8x435xf32, #tpu.memory_space<vmem>>, vector<8x288xf32>
    %c24 = arith.constant 24 : index
    %c0_58 = arith.constant 0 : index
    %70 = vector.load %arg10[%c24, %c0_58] : memref<72x288xf32, #tpu.memory_space<vmem>>, vector<8x288xf32>
    tpu.vector_store %arg10[%c24, %c0_58], %69 {strides = array<i32>} : memref<72x288xf32, #tpu.memory_space<vmem>>, vector<8x288xf32>,
    %c0_59 = arith.constant 0 : index
    %c128_60 = arith.constant 128 : index
    %71 = vector.load %arg9[%c0_59, %c128_60] : memref<8x435xf32, #tpu.memory_space<vmem>>, vector<8x288xf32>
    %c32_61 = arith.constant 32 : index
    %c0_62 = arith.constant 0 : index
    %72 = vector.load %arg10[%c32_61, %c0_62] : memref<72x288xf32, #tpu.memory_space<vmem>>, vector<8x288xf32>
    tpu.vector_store %arg10[%c32_61, %c0_62], %71 {strides = array<i32>} : memref<72x288xf32, #tpu.memory_space<vmem>>, vector<8x288xf32>,
    %c0_63 = arith.constant 0 : index
    %c129 = arith.constant 129 : index
    %73 = vector.load %arg9[%c0_63, %c129] : memref<8x435xf32, #tpu.memory_space<vmem>>, vector<8x288xf32>
    %c40 = arith.constant 40 : index
    %c0_64 = arith.constant 0 : index
    %74 = vector.load %arg10[%c40, %c0_64] : memref<72x288xf32, #tpu.memory_space<vmem>>, vector<8x288xf32>
    tpu.vector_store %arg10[%c40, %c0_64], %73 {strides = array<i32>} : memref<72x288xf32, #tpu.memory_space<vmem>>, vector<8x288xf32>,
    %c0_65 = arith.constant 0 : index
    %c145 = arith.constant 145 : index
    %75 = vector.load %arg9[%c0_65, %c145] : memref<8x435xf32, #tpu.memory_space<vmem>>, vector<8x288xf32>
    %c48_66 = arith.constant 48 : index
    %c0_67 = arith.constant 0 : index
    %76 = vector.load %arg10[%c48_66, %c0_67] : memref<72x288xf32, #tpu.memory_space<vmem>>, vector<8x288xf32>
    tpu.vector_store %arg10[%c48_66, %c0_67], %75 {strides = array<i32>} : memref<72x288xf32, #tpu.memory_space<vmem>>, vector<8x288xf32>,
    %c0_68 = arith.constant 0 : index
    %c146 = arith.constant 146 : index
    %77 = vector.load %arg9[%c0_68, %c146] : memref<8x435xf32, #tpu.memory_space<vmem>>, vector<8x288xf32>
    %c56 = arith.constant 56 : index
    %c0_69 = arith.constant 0 : index
    %78 = vector.load %arg10[%c56, %c0_69] : memref<72x288xf32, #tpu.memory_space<vmem>>, vector<8x288xf32>
    tpu.vector_store %arg10[%c56, %c0_69], %77 {strides = array<i32>} : memref<72x288xf32, #tpu.memory_space<vmem>>, vector<8x288xf32>,
    %c0_70 = arith.constant 0 : index
    %c147 = arith.constant 147 : index
    %79 = vector.load %arg9[%c0_70, %c147] : memref<8x435xf32, #tpu.memory_space<vmem>>, vector<8x288xf32>
    %c64_71 = arith.constant 64 : index
    %c0_72 = arith.constant 0 : index
    %80 = vector.load %arg10[%c64_71, %c0_72] : memref<72x288xf32, #tpu.memory_space<vmem>>, vector<8x288xf32>
    tpu.vector_store %arg10[%c64_71, %c0_72], %79 {strides = array<i32>} : memref<72x288xf32, #tpu.memory_space<vmem>>, vector<8x288xf32>,
    %c0_73 = arith.constant 0 : index
    %c0_74 = arith.constant 0 : index
    %81 = vector.load %arg5[%c0_73, %c0_74] : memref<8x72xf32, #tpu.memory_space<vmem>>, vector<8x72xf32>
    %c0_75 = arith.constant 0 : index
    %c0_76 = arith.constant 0 : index
    %82 = vector.load %arg10[%c0_75, %c0_76] : memref<72x288xf32, #tpu.memory_space<vmem>>, vector<72x288xf32>
    %cst_77 = arith.constant dense<0.000000e+00> : vector<8x288xf32>
    %83 = tpu.matmul %81, %82, %cst_77 {dimension_numbers = #tpu.dot_dimension_numbers<[1], [0], [0], [1], [0, 0, 1, 1], [], []>} : vector<8x72xf32>, vector<72x288xf32>, vector<8x288xf32> -> vector<8x288xf32>
    %c0_78 = arith.constant 0 : index
    %c0_79 = arith.constant 0 : index
    %84 = vector.load %arg6[%c0_78, %c0_79] : memref<8x1xf32, #tpu.memory_space<vmem>>, vector<8x1xf32>
    %85 = vector.broadcast %84 : vector<8x1xf32> to vector<8x288xf32>
    %86 = arith.addf %83, %85 : vector<8x288xf32>
    %87 = vector.broadcast %0 : vector<1x288xf32> to vector<8x288xf32>
    %88 = arith.mulf %86, %87 : vector<8x288xf32>
    %cst_80 = arith.constant dense<0.000000e+00> : vector<8xf32>
    %89 = vector.multi_reduction <add>, %88, %cst_80 [1] : vector<8x288xf32> to vector<8xf32>
    %90 = vector.shape_cast %89 : vector<8xf32> to vector<8x1xf32>
    %cst_81 = arith.constant 3.906250e-03 : f32
    %91 = vector.broadcast %cst_81 : f32 to vector<8x1xf32>
    %92 = arith.mulf %90, %91 : vector<8x1xf32>
    %93 = vector.broadcast %92 : vector<8x1xf32> to vector<8x288xf32>
    %94 = arith.subf %86, %93 : vector<8x288xf32>
    %95 = arith.mulf %94, %94 : vector<8x288xf32>
    %96 = vector.broadcast %0 : vector<1x288xf32> to vector<8x288xf32>
    %97 = arith.mulf %95, %96 : vector<8x288xf32>
    %cst_82 = arith.constant dense<0.000000e+00> : vector<8xf32>
    %98 = vector.multi_reduction <add>, %97, %cst_82 [1] : vector<8x288xf32> to vector<8xf32>
    %99 = vector.shape_cast %98 : vector<8xf32> to vector<8x1xf32>
    %cst_83 = arith.constant 3.906250e-03 : f32
    %100 = vector.broadcast %cst_83 : f32 to vector<8x1xf32>
    %101 = arith.mulf %99, %100 : vector<8x1xf32>
    %cst_84 = arith.constant 9.99999974E-6 : f32
    %102 = vector.broadcast %cst_84 : f32 to vector<8x1xf32>
    %103 = arith.addf %101, %102 : vector<8x1xf32>
    %104 = math.rsqrt %103 : vector<8x1xf32>
    %105 = vector.broadcast %104 : vector<8x1xf32> to vector<8x288xf32>
    %106 = arith.mulf %94, %105 : vector<8x288xf32>
    %cst_85 = arith.constant 0.000000e+00 : f32
    %107 = vector.broadcast %cst_85 : f32 to vector<8x288xf32>
    %108 = arith.maximumf %106, %107 : vector<8x288xf32>
    %c0_86 = arith.constant 0 : index
    %c0_87 = arith.constant 0 : index
    %c0_88 = arith.constant 0 : index
    %109 = vector.load %arg7[%c0_86, %c0_87, %c0_88] : memref<1x8x288xf32, #tpu.memory_space<vmem>>, vector<1x8x288xf32>
    %110 = vector.shape_cast %109 : vector<1x8x288xf32> to vector<8x288xf32>
    %111 = vector.shape_cast %108 : vector<8x288xf32> to vector<1x8x288xf32>
    tpu.vector_store %arg7[%c0_86, %c0_87, %c0_88], %111 {strides = array<i32>} : memref<1x8x288xf32, #tpu.memory_space<vmem>>, vector<1x8x288xf32>,
    return
  }
  func.func @transform_0(%arg0: i32) -> (i32, i32, i32) {
    %c0_i32 = arith.constant 0 : i32
    %c0_i32_0 = arith.constant 0 : i32
    %c0_i32_1 = arith.constant 0 : i32
    return %arg0, %c0_i32, %c0_i32_0 : i32, i32, i32
  }
  func.func @transform_1(%arg0: i32) -> (i32, i32) {
    %c0_i32 = arith.constant 0 : i32
    %c0_i32_0 = arith.constant 0 : i32
    %c0_i32_1 = arith.constant 0 : i32
    return %c0_i32, %c0_i32_0 : i32, i32
  }
  func.func @transform_2(%arg0: i32) -> (i32, i32) {
    %c0_i32 = arith.constant 0 : i32
    %c0_i32_0 = arith.constant 0 : i32
    %c0_i32_1 = arith.constant 0 : i32
    return %c0_i32, %c0_i32_0 : i32, i32
  }
  func.func @transform_3(%arg0: i32) -> (i32, i32) {
    %c0_i32 = arith.constant 0 : i32
    %c0_i32_0 = arith.constant 0 : i32
    %c0_i32_1 = arith.constant 0 : i32
    return %c0_i32, %c0_i32_0 : i32, i32
  }
  func.func @transform_4(%arg0: i32) -> (i32, i32) {
    %c0_i32 = arith.constant 0 : i32
    %c0_i32_0 = arith.constant 0 : i32
    %c0_i32_1 = arith.constant 0 : i32
    return %c0_i32, %c0_i32_0 : i32, i32
  }
  func.func @transform_5(%arg0: i32) -> (i32, i32) {
    %c0_i32 = arith.constant 0 : i32
    %c0_i32_0 = arith.constant 0 : i32
    %c0_i32_1 = arith.constant 0 : i32
    return %c0_i32, %c0_i32_0 : i32, i32
  }
  func.func @transform_6(%arg0: i32) -> (i32, i32, i32) {
    %c0_i32 = arith.constant 0 : i32
    %c0_i32_0 = arith.constant 0 : i32
    %c0_i32_1 = arith.constant 0 : i32
    return %arg0, %c0_i32, %c0_i32_0 : i32, i32, i32
  }
}

</mosaic_0001>

<bundles_post_ra>
// kernel: up_cat3_forward.2
= control target key start
LH: loop header
LB: loop body
LE: loop exit
PB: predicated region body
PF: predicated region fallthrough
CT: control target
= control target key end

     0   :  { %vm29_vm0 = vcmask 64512   ;;  %v70_v0 = vmov 0   ;;  %s112_s2 = inlined_call_operand.vmem [shape: f32[16,1], index: 2, kind: input, shape index: {}]   ;;  %s113_s1 = inlined_call_operand.vmem [shape: f32[8,128], index: 1, kind: input, shape index: {}]   ;;  %s114_s0 = inlined_call_operand.vmem [shape: f32[16,8], index: 0, kind: input, shape index: {}]   ;;  %s115_s3 = inlined_call_operand.vmem [shape: f32[16,128], index: 3, kind: output, shape index: {}]  }
   0x1   :  { %69 = vset.pattern.permute.xlu0 %v70_v0  ;;  %v17_v1 = vld [vmem:[%s112_s2] sm:$0xff]  ;;  %v15_v4 = vld [vmem:[%s114_s0 + $0x8] sm:$0xff] }
   0x2   :  { %v16_v2 = vld [vmem:[%s113_s1] sm:$0xff]  ;;  %21 = vperm.xlu0 %69, %v17_v1   ;;  %v18_v5 = vld [vmem:[%s112_s2 + $0x8] sm:$0xff] }
   0x3   :  { %v14_v3 = vld [vmem:[%s114_s0] sm:$0xff]  ;;  %51 = vmatpush.msra.mxu0 %v16_v2  ;;  %67 = vmatpush.msra.mxu1 %v16_v2 }
   0x4   :  { %65 = vmatmul.msk.f32.vlgmr.msra.gmra.mxu0 %vm29_vm0, %v14_v3  ;;  %66 = vmatmul.msk.f32.vlgmr.msra.gmra.mxu1 %vm29_vm0, %v15_v4 }
   0xa   :  { %26 = vperm.xlu0 %69, %v18_v5  }
  0x74   :  { %v22_v6 = vpop.permute.xlu0 %21 }
  0x7c   :  { %v27_v8 = vpop.permute.xlu0 %26 }
  0x81   :  { %v53_v7 = vpop.f32.mrf.mxu0  ;;  %v56_v10 = vpop.f32.mrf.mxu1 }
  0x82   :  { %v54_v9 = vadd.f32 %v53_v7, %v22_v6  ;;  %v57_v11 = vadd.f32 %v56_v10, %v27_v8 }
  0x84   :  { %59 = vst [vmem:[%s115_s3] sm:$0xff] %v54_v9 }
  0x85   :  { %60 = vst [vmem:[%s115_s3 + $0x8] sm:$0xff] %v57_v11 }

// kernel: up_cat3_forward.3
= control target key start
LH: loop header
LB: loop body
LE: loop exit
PB: predicated region body
PF: predicated region fallthrough
CT: control target
= control target key end

     0   :  { %s1329_s21 = smov 0   ;;  %s1593_s0 = inlined_call_operand.vmem [shape: f32[2,16,342], index: 0, kind: input, shape index: {}]   ;;  %s1594_s1 = inlined_call_operand.vmem [shape: f32[1,288], index: 1, kind: input, shape index: {}]   ;;  %s1595_s2 = inlined_call_operand.vmem [shape: f32[8,144], index: 2, kind: input, shape index: {}]   ;;  %s1596_s3 = inlined_call_operand.vmem [shape: f32[8,1], index: 3, kind: input, shape index: {}]   ;;  %s1597_s4 = inlined_call_operand.vmem [shape: f32[8,72], index: 4, kind: input, shape index: {}]   ;;  %s1598_s5 = inlined_call_operand.vmem [shape: f32[8,1], index: 5, kind: input, shape index: {}]   ;;  %s1599_s6 = inlined_call_operand.vmem [shape: f32[2,8,288], index: 6, kind: output, shape index: {}]  }
   0x1 LB: > { %s1225_s22 = sadd.s32 4294967295, %s1277_s21   ;;  %p1229_p0 = scmp.ge.s32.totalorder %s1277_s21, 1  ;;  %s1277_s21 = sphi %s1329_s21, %s16_s21  }
   0x2   : > { %p212_p1 = scmp.lt.s32.totalorder %s1277_s21, 3 }
   0x4   : > { %p213_p2 = pnand %p1229_p0, %p212_p1 }
   0x5   : > { %p242_p3 = scmp.lt.s32.totalorder (!%p213_p2), %s1225_s22, 1  ;;  %s1279_s27 = smov (!%p213_p2), 91  }
   0x6   : > { %216 = sbr.rel (%p213_p2) target bundleno = 1321 (0x529), region = 44  ;;  %s1280_s28 = smov (!%p213_p2), 92  }
   0x7   : > { %s1281_s29 = smov (!%p213_p2), 108   ;;  %s1282_s30 = smov (!%p213_p2), 109  }
   0x8   : > { %s1283_s7 = smov (!%p213_p2), 110   ;;  %s1284_s8 = smov (!%p213_p2), 126  }
   0x9   : > { %s1285_s9 = smov (!%p213_p2), 90   ;;  %s1286_s10 = smov (!%p213_p2), 127  }
   0xa   : > { %s1289_s19 = smov (!%p213_p2), 1   ;;  %s1290_s20 = smov (!%p213_p2), 17  }
   0xb   : > { %s1601_s22 = smov (!%p242_p3, %s1225_s22), 1  ;;  %vm261_vm0 = vcmask 261120   ;;  %vm495_vm1 = vcmask 752640   ;;  %vm536_vm2 = vcmask 744448   ;;  %vm454_vm3 = vcmask 883712   ;;  %s1292_s24 = smov 111  }
   0xc   : > { %s1240_s23 = smul.u32 48, %s1601_s22  ;;  %vm413_vm4 = vcmask 891904   ;;  %vm372_vm5 = vcmask 900096   ;;  %vm331_vm6 = vcmask 1031168   ;;  %vm577_vm7 = vcmask 736256   ;;  %s1293_s25 = smov 19  }
   0xd   : > { %vm290_vm8 = vcmask 1039360   ;;  %vm656_vm9 = vcmask 130048   ;;  %vm832_vm10 = vcmask 417024   ;;  %vm979_vm14 = vcmask 908288  }
   0xe   : > { %s246_s26 = scalar_lea.vmem %s1593_s0, %s1240_s23  ;;  %s1291_s23 = smov 18   ;;  %vm931_vm15 = vcmask 7168  }
   0xf   : > { %v1343_v0 = vld [vmem:[%s246_s26 + $0x20] sm:$0xff]  ;;  %v1345_v1 = vld [vmem:[%s246_s26 + $0x8] sm:$0xff]  ;;  %v1350_v2 = vld [vmem:[%s246_s26 + $0x18] sm:$0xff] }
  0x10   : > { %532 = vrot.lane.b32.xlu0 %v1343_v0, %s1279_s27  ;;  %526 = vrot.lane.b32.xlu1 %v1345_v1, %s1279_s27  ;;  %v1352_v3 = vld [vmem:[%s246_s26] sm:$0xff]  ;;  %v517_v4 = vld [vmem:[%s246_s26 + $0x28] sm:$0xff] }
  0x11   : > { %491 = vrot.lane.b32.xlu2 %v1343_v0, %s1280_s28  ;;  %v514_v5 = vld [vmem:[%s246_s26 + $0x10] sm:$0xff]  ;;  %265 = vst.msk [vmem:[#allocation2 + $0x28] sm:$0xff] %vm261_vm0, %v517_v4 }
  0x12   : > { %262 = vst.msk [vmem:[#allocation2 + $0x10] sm:$0xff] %vm261_vm0, %v514_v5 }
  0x18   : > { %534 = vrot.lane.b32.xlu0 %v517_v4, %s1279_s27  ;;  %528 = vrot.lane.b32.xlu1 %v514_v5, %s1279_s27 }
  0x19   : > { %493 = vrot.lane.b32.xlu2 %v517_v4, %s1280_s28 }
  0x20   : > { %487 = vrot.lane.b32.xlu1 %v514_v5, %s1280_s28  ;;  %485 = vrot.lane.b32.xlu0 %v1345_v1, %s1280_s28 }
  0x21   : > { %530 = vrot.lane.b32.xlu2 %v1350_v2, %s1279_s27 }
  0x28   : > { %452 = vrot.lane.b32.xlu1 %v517_v4, %s1281_s29  ;;  %450 = vrot.lane.b32.xlu0 %v1343_v0, %s1281_s29 }
  0x29   : > { %524 = vrot.lane.b32.xlu2 %v1352_v3, %s1279_s27 }
  0x30   : > { %446 = vrot.lane.b32.xlu1 %v514_v5, %s1281_s29  ;;  %444 = vrot.lane.b32.xlu0 %v1345_v1, %s1281_s29 }
  0x31   : > { %489 = vrot.lane.b32.xlu2 %v1350_v2, %s1280_s28 }
  0x38   : > { %411 = vrot.lane.b32.xlu1 %v517_v4, %s1282_s30  ;;  %409 = vrot.lane.b32.xlu0 %v1343_v0, %s1282_s30 }
  0x39   : > { %483 = vrot.lane.b32.xlu2 %v1352_v3, %s1280_s28 }
  0x40   : > { %405 = vrot.lane.b32.xlu1 %v514_v5, %s1282_s30  ;;  %403 = vrot.lane.b32.xlu0 %v1345_v1, %s1282_s30 }
  0x41   : > { %448 = vrot.lane.b32.xlu2 %v1350_v2, %s1281_s29 }
  0x48   : > { %370 = vrot.lane.b32.xlu1 %v517_v4, %s1283_s7  ;;  %368 = vrot.lane.b32.xlu0 %v1343_v0, %s1283_s7 }
  0x49   : > { %442 = vrot.lane.b32.xlu2 %v1352_v3, %s1281_s29 }
  0x50   : > { %364 = vrot.lane.b32.xlu1 %v514_v5, %s1283_s7  ;;  %362 = vrot.lane.b32.xlu0 %v1345_v1, %s1283_s7 }
  0x51   : > { %407 = vrot.lane.b32.xlu2 %v1350_v2, %s1282_s30 }
  0x58   : > { %329 = vrot.lane.b32.xlu1 %v517_v4, %s1284_s8  ;;  %327 = vrot.lane.b32.xlu0 %v1343_v0, %s1284_s8 }
  0x59   : > { %401 = vrot.lane.b32.xlu2 %v1352_v3, %s1282_s30 }
  0x60   : > { %323 = vrot.lane.b32.xlu1 %v514_v5, %s1284_s8  ;;  %321 = vrot.lane.b32.xlu0 %v1345_v1, %s1284_s8 }
  0x61   : > { %366 = vrot.lane.b32.xlu2 %v1350_v2, %s1283_s7 }
  0x68   : > { %575 = vrot.lane.b32.xlu1 %v517_v4, %s1285_s9  ;;  %573 = vrot.lane.b32.xlu0 %v1343_v0, %s1285_s9 }
  0x69   : > { %286 = vrot.lane.b32.xlu2 %v1343_v0, %s1286_s10 }
  0x6b   : > { %v492_v6 = vpop.permute.xlu2 %491 }
  0x70   : > { %360 = vrot.lane.b32.xlu1 %v1352_v3, %s1283_s7  ;;  %288 = vrot.lane.b32.xlu0 %v517_v4, %s1286_s10 }
  0x71   : > { %567 = vrot.lane.b32.xlu2 %v1345_v1, %s1285_s9 }
  0x73   : > { %v494_v7 = vpop.permute.xlu2 %493 }
  0x74   : > { %v499_v8 = vsel %vm495_vm1, %v492_v6, %v494_v7  ;;  %511 = vst.msk [vmem:[#allocation2 + $0x148] sm:$0xff] %vm261_vm0, %v494_v7 }
  0x78   : > { %569 = vrot.lane.b32.xlu0 %v514_v5, %s1285_s9  ;;  %280 = vrot.lane.b32.xlu1 %v1345_v1, %s1286_s10 }
  0x79   : > { %282 = vrot.lane.b32.xlu2 %v514_v5, %s1286_s10 }
  0x7b   : > { %v531_v9 = vpop.permute.xlu2 %530 }
  0x80   : > { %325 = vrot.lane.b32.xlu0 %v1350_v2, %s1284_s8  ;;  %571 = vrot.lane.b32.xlu1 %v1350_v2, %s1285_s9 }
  0x81   : > { %319 = vrot.lane.b32.xlu2 %v1352_v3, %s1284_s8 }
  0x82   : > { %v533_v10 = vpop.permute.xlu0 %532  ;;  %v527_v11 = vpop.permute.xlu1 %526 }
  0x83   : > { %v539_v12 = vsel %vm536_vm2, %v531_v9, %v533_v10  ;;  %v525_v13 = vpop.permute.xlu2 %524 }
  0x84   : > { %v537_v14 = vsel %vm536_vm2, %v525_v13, %v527_v11  ;;  %660 = vmatpush.msra.mxu0 %v539_v12 }
  0x86   : > { %661 = vmatpush.msra.mxu0 %v537_v14 }
  0x88   : > { %565 = vrot.lane.b32.xlu0 %v1352_v3, %s1285_s9  ;;  %284 = vrot.lane.b32.xlu1 %v1350_v2, %s1286_s10 }
  0x89   : > { %278 = vrot.lane.b32.xlu2 %v1352_v3, %s1286_s10 }
  0x8a   : > { %v535_v15 = vpop.permute.xlu0 %534  ;;  %v529_v16 = vpop.permute.xlu1 %528 }
  0x8b   : > { %v540_v17 = vsel %vm536_vm2, %v533_v10, %v535_v15  ;;  %552 = vst.msk [vmem:[#allocation2 + $0x178] sm:$0xff] %vm261_vm0, %v535_v15  ;;  %v538_v18 = vsel %vm536_vm2, %v527_v11, %v529_v16  ;;  %v490_v19 = vpop.permute.xlu2 %489  ;;  %vm879_vm2 = vcmask 146432  }
  0x8c   : > { %v498_v20 = vsel %vm495_vm1, %v490_v19, %v492_v6  ;;  %700 = vmatpush.msra.mxu2 %v540_v17  ;;  %549 = vst.msk [vmem:[#allocation2 + $0x160] sm:$0xff] %vm261_vm0, %v529_v16  ;;  %v595_v19 = vld [vmem:[%s1595_s2 + $0x8] sm:$0xff] }
  0x8d   : > { %662 = vmatpush.msra.mxu0 %v498_v20  ;;  %v594_v20 = vld [vmem:[%s1595_s2] sm:$0xff] }
  0x8e   : > { %701 = vmatpush.msra.mxu2 %v538_v18 }
  0x90   : > { %702 = vmatpush.msra.mxu2 %v499_v8 }
  0x92   : > { %v488_v21 = vpop.permute.xlu1 %487  ;;  %v486_v22 = vpop.permute.xlu0 %485 }
  0x93   : > { %508 = vst.msk [vmem:[#allocation2 + $0x130] sm:$0xff] %vm261_vm0, %v488_v21  ;;  %v497_v23 = vsel %vm495_vm1, %v486_v22, %v488_v21  ;;  %v484_v24 = vpop.permute.xlu2 %483 }
  0x94   : > { %v496_v25 = vsel %vm495_vm1, %v484_v24, %v486_v22  ;;  %703 = vmatpush.msra.mxu2 %v497_v23  ;;  %vm905_vm1 = vcmask 138240  }
  0x95   : > { %663 = vmatpush.msra.mxu0 %v496_v25 }
  0x9a   : > { %v453_v26 = vpop.permute.xlu1 %452  ;;  %v451_v27 = vpop.permute.xlu0 %450 }
  0x9b   : > { %470 = vst.msk [vmem:[#allocation2 + $0x118] sm:$0xff] %vm261_vm0, %v453_v26  ;;  %v458_v28 = vsel %vm454_vm3, %v451_v27, %v453_v26  ;;  %v449_v29 = vpop.permute.xlu2 %448 }
  0x9c   : > { %v457_v30 = vsel %vm454_vm3, %v449_v29, %v451_v27  ;;  %704 = vmatpush.msra.mxu2 %v458_v28  ;;  %v643_v28 = vld [vmem:[#allocation2 + $0x178] sm:$0xff]  ;;  %v650_v29 = vld [vmem:[%s1596_s3] sm:$0xff] }
  0x9d   : > { %664 = vmatpush.msra.mxu0 %v457_v30  ;;  %v1287_v30 = vmov 0  }
  0x9e   : > { %1265 = vset.pattern.permute.xlu0 %v1287_v30  ;;  %1266 = vset.pattern.permute.xlu1 %v1287_v30 }
  0x9f   : > { %653 = vperm.xlu0 %1265, %v650_v29  }
  0xa2   : > { %v447_v31 = vpop.permute.xlu1 %446  ;;  %v445_v32 = vpop.permute.xlu0 %444 }
  0xa3   : > { %467 = vst.msk [vmem:[#allocation2 + $0x100] sm:$0xff] %vm261_vm0, %v447_v31  ;;  %v456_v33 = vsel %vm454_vm3, %v445_v32, %v447_v31  ;;  %v443_v34 = vpop.permute.xlu2 %442  ;;  %v640_v31 = vld [vmem:[#allocation2 + $0x160] sm:$0xff] }
  0xa4   : > { %v455_v35 = vsel %vm454_vm3, %v443_v34, %v445_v32  ;;  %705 = vmatpush.msra.mxu2 %v456_v33  ;;  %v637_v32 = vld [vmem:[#allocation2 + $0x148] sm:$0xff]  ;;  %v634_v33 = vld [vmem:[#allocation2 + $0x130] sm:$0xff]  ;;  %v631_v34 = vld [vmem:[#allocation2 + $0x118] sm:$0xff]  ;;  %vm853_vm3 = vcmask 154624  }
  0xa5   : > { %665 = vmatpush.msra.mxu0 %v455_v35 }
  0xaa   : > { %v412_v36 = vpop.permute.xlu1 %411  ;;  %v410_v37 = vpop.permute.xlu0 %409  ;;  %v628_v35 = vld [vmem:[#allocation2 + $0x100] sm:$0xff] }
  0xab   : > { %429 = vst.msk [vmem:[#allocation2 + $0xe8] sm:$0xff] %vm261_vm0, %v412_v36  ;;  %v417_v38 = vsel %vm413_vm4, %v410_v37, %v412_v36  ;;  %v408_v39 = vpop.permute.xlu2 %407 }
  0xac   : > { %v416_v40 = vsel %vm413_vm4, %v408_v39, %v410_v37  ;;  %706 = vmatpush.msra.mxu2 %v417_v38 }
  0xad   : > { %666 = vmatpush.msra.mxu0 %v416_v40 }
  0xb2   : > { %v406_v41 = vpop.permute.xlu1 %405  ;;  %v404_v42 = vpop.permute.xlu0 %403  ;;  %v625_v36 = vld [vmem:[#allocation2 + $0xe8] sm:$0xff] }
  0xb3   : > { %426 = vst.msk [vmem:[#allocation2 + $0xd0] sm:$0xff] %vm261_vm0, %v406_v41  ;;  %v415_v43 = vsel %vm413_vm4, %v404_v42, %v406_v41  ;;  %v402_v44 = vpop.permute.xlu2 %401 }
  0xb4   : > { %v414_v45 = vsel %vm413_vm4, %v402_v44, %v404_v42  ;;  %707 = vmatpush.msra.mxu2 %v415_v43  ;;  %v601_v42 = vld [vmem:[#allocation2 + $0x28] sm:$0xff]  ;;  %v598_v43 = vld [vmem:[#allocation2 + $0x10] sm:$0xff] }
  0xb5   : > { %667 = vmatpush.msra.mxu0 %v414_v45 }
  0xba   : > { %v371_v46 = vpop.permute.xlu1 %370  ;;  %v369_v47 = vpop.permute.xlu0 %368  ;;  %v622_v37 = vld [vmem:[#allocation2 + $0xd0] sm:$0xff] }
  0xbb   : > { %388 = vst.msk [vmem:[#allocation2 + $0xb8] sm:$0xff] %vm261_vm0, %v371_v46  ;;  %v376_v48 = vsel %vm372_vm5, %v369_v47, %v371_v46  ;;  %v367_v49 = vpop.permute.xlu2 %366 }
  0xbc   : > { %v375_v50 = vsel %vm372_vm5, %v367_v49, %v369_v47  ;;  %708 = vmatpush.msra.mxu2 %v376_v48 }
  0xbd   : > { %668 = vmatpush.msra.mxu0 %v375_v50 }
  0xc2   : > { %v365_v51 = vpop.permute.xlu1 %364  ;;  %v363_v52 = vpop.permute.xlu0 %362  ;;  %v619_v38 = vld [vmem:[#allocation2 + $0xb8] sm:$0xff] }
  0xc3   : > { %385 = vst.msk [vmem:[#allocation2 + $0xa0] sm:$0xff] %vm261_vm0, %v365_v51  ;;  %v374_v53 = vsel %vm372_vm5, %v363_v52, %v365_v51  ;;  %v1428_v54 = vpop.permute.xlu2 %286  ;;  %v252_v51 = vld [vmem:[%s1594_s1] sm:$0x7] }
  0xc4   : > { %709 = vmatpush.msra.mxu2 %v374_v53  ;;  %v1470_v53 = vperm.slane %v252_v51, 0 }
  0xca   : > { %v330_v55 = vpop.permute.xlu1 %329  ;;  %v328_v56 = vpop.permute.xlu0 %327  ;;  %v616_v39 = vld [vmem:[#allocation2 + $0xa0] sm:$0xff] }
  0xcb   : > { %347 = vst.msk [vmem:[#allocation2 + $0x88] sm:$0xff] %vm261_vm0, %v330_v55  ;;  %v335_v57 = vsel %vm331_vm6, %v328_v56, %v330_v55  ;;  %v568_v58 = vpop.permute.xlu2 %567  ;;  %v1472_v55 = vperm.slane %v252_v51, 1 }
  0xcc   : > { %710 = vmatpush.msra.mxu2 %v335_v57 }
  0xd2   : > { %v324_v59 = vpop.permute.xlu1 %323  ;;  %v322_v60 = vpop.permute.xlu0 %321 }
  0xd3   : > { %344 = vst.msk [vmem:[#allocation2 + $0x70] sm:$0xff] %vm261_vm0, %v324_v59  ;;  %v333_v61 = vsel %vm331_vm6, %v322_v60, %v324_v59  ;;  %v283_v62 = vpop.permute.xlu2 %282  ;;  %v1474_v59 = vperm.slane %v252_v51, 2 }
  0xd4   : > { %711 = vmatpush.msra.mxu2 %v333_v61  ;;  %303 = vst.msk [vmem:[#allocation2 + $0x40] sm:$0xff] %vm261_vm0, %v283_v62 }
  0xda   : > { %v576_v63 = vpop.permute.xlu1 %575  ;;  %v574_v4 = vpop.permute.xlu0 %573  ;;  %v610_v40 = vld [vmem:[#allocation2 + $0x70] sm:$0xff] }
  0xdb   : > { %593 = vst.msk [vmem:[#allocation2 + $0x1a8] sm:$0xff] %vm261_vm0, %v576_v63  ;;  %v581_v5 = vsel %vm577_vm7, %v574_v4, %v576_v63  ;;  %v320_v6 = vpop.permute.xlu2 %319 }
  0xdc   : > { %v332_v7 = vsel %vm331_vm6, %v320_v6, %v322_v60  ;;  %734 = vmatpush.msra.mxu3 %v581_v5 }
  0xe2   : > { %v361_v8 = vpop.permute.xlu1 %360  ;;  %v289_v9 = vpop.permute.xlu0 %288  ;;  %v649_v18 = vld [vmem:[#allocation2 + $0x1a8] sm:$0xff] }
  0xe3   : > { %v373_v10 = vsel %vm372_vm5, %v361_v8, %v363_v52  ;;  %v294_v11 = vsel %vm290_vm8, %v1428_v54, %v289_v9  ;;  %306 = vst.msk [vmem:[#allocation2 + $0x58] sm:$0xff] %vm261_vm0, %v289_v9  ;;  %v279_v12 = vpop.permute.xlu2 %278 }
  0xe4   : > { %669 = vmatpush.msra.mxu0 %v373_v10  ;;  %712 = vmatpush.msra.mxu2 %v294_v11 }
  0xea   : > { %v570_v13 = vpop.permute.xlu0 %569  ;;  %v281_v14 = vpop.permute.xlu1 %280  ;;  %v607_v41 = vld [vmem:[#allocation2 + $0x58] sm:$0xff] }
  0xeb   : > { %v579_v15 = vsel %vm577_vm7, %v568_v58, %v570_v13  ;;  %590 = vst.msk [vmem:[#allocation2 + $0x190] sm:$0xff] %vm261_vm0, %v570_v13  ;;  %v292_v16 = vsel %vm290_vm8, %v281_v14, %v283_v62  ;;  %v291_v17 = vsel %vm290_vm8, %v279_v12, %v281_v14 }
  0xec   : > { %735 = vmatpush.msra.mxu3 %v579_v15  ;;  %713 = vmatpush.msra.mxu2 %v292_v16 }
  0xed   : > { %1233 = vmatmul.msk.f32.vlgmr.msra.gmra.mxu3 %vm656_vm9, %v595_v19 }
  0xee   : > { %774 = vmatpush.msrb.mxu3 %v649_v18  ;;  %714 = vmatpush.msra.mxu2 %v1343_v0 }
  0xf0   : > { %715 = vmatpush.msra.mxu2 %v1345_v1 }
  0xf1   : > { %716 = vmatmul.f32.vlgmr.msra.gmra.mxu2 %v594_v20 }
  0xf2   : > { %v326_v21 = vpop.permute.xlu0 %325  ;;  %v572_v22 = vpop.permute.xlu1 %571  ;;  %v646_v23 = vld [vmem:[#allocation2 + $0x190] sm:$0xff] }
  0xf3   : > { %v334_v24 = vsel %vm331_vm6, %v326_v21, %v328_v56  ;;  %v580_v25 = vsel %vm577_vm7, %v572_v22, %v574_v4  ;;  %775 = vmatpush.msrb.mxu3 %v646_v23 }
  0xf4   : > { %670 = vmatpush.msra.mxu0 %v334_v24  ;;  %694 = vmatpush.msra.mxu1 %v580_v25 }
  0xf5   : > { %1234 = vmatmul.msk.f32.vlgmr.msrb.gmra.mxu3 %vm656_vm9, %v595_v19 }
  0xf6   : > { %671 = vmatpush.msra.mxu0 %v332_v7  ;;  %v1288_v7 = vmov 0.0  }
  0xf7   : > { %833 = vst.msk [vmem:[#allocation3 + $0x18] sm:$0xff] %vm832_vm10, %v1288_v7 }
  0xfa   : > { %v566_v0 = vpop.permute.xlu0 %565  ;;  %v285_v26 = vpop.permute.xlu1 %284 }
  0xfb   : > { %v578_v27 = vsel %vm577_vm7, %v566_v0, %v568_v58  ;;  %v293_v1 = vsel %vm290_vm8, %v285_v26, %v1428_v54 }
  0xfc   : > { %672 = vmatpush.msra.mxu0 %v293_v1  ;;  %695 = vmatpush.msra.mxu1 %v578_v27 }
  0xfd   : > { %1232 = vmatmul.msk.f32.vlgmr.msra.gmra.mxu1 %vm656_vm9, %v595_v19 }
  0xfe   : > { %740 = vmatpush.msrb.mxu1 %v643_v28  ;;  %673 = vmatpush.msra.mxu0 %v291_v17 }
 0x100   : > { %741 = vmatpush.msrb.mxu1 %v640_v31  ;;  %674 = vmatpush.msra.mxu0 %v1350_v2  ;;  %v613_v2 = vld [vmem:[#allocation2 + $0x88] sm:$0xff] }
 0x102   : > { %742 = vmatpush.msrb.mxu1 %v637_v32  ;;  %675 = vmatpush.msra.mxu0 %v1352_v3  ;;  %v604_v3 = vld [vmem:[#allocation2 + $0x40] sm:$0xff] }
 0x103   : > { %676 = vmatmul.f32.vlgmr.msra.gmra.mxu0 %v594_v20 }
 0x104   : > { %743 = vmatpush.msrb.mxu1 %v634_v33 }
 0x106   : > { %744 = vmatpush.msrb.mxu1 %v631_v34 }
 0x108   : > { %745 = vmatpush.msrb.mxu1 %v628_v35 }
 0x10a   : > { %746 = vmatpush.msrb.mxu1 %v625_v36 }
 0x10c   : > { %747 = vmatpush.msrb.mxu1 %v622_v37 }
 0x10e   : > { %748 = vmatpush.msrb.mxu1 %v619_v38 }
 0x110   : > { %749 = vmatpush.msrb.mxu1 %v616_v39 }
 0x111   : > { %v654_v44 = vpop.permute.xlu0 %653 }
 0x112   : > { %750 = vmatpush.msrb.mxu1 %v613_v2 }
 0x114   : > { %751 = vmatpush.msrb.mxu1 %v610_v40 }
 0x116   : > { %752 = vmatpush.msrb.mxu1 %v607_v41 }
 0x118   : > { %753 = vmatpush.msrb.mxu1 %v604_v3 }
 0x11a   : > { %754 = vmatpush.msrb.mxu1 %v601_v42 }
 0x11c   : > { %755 = vmatpush.msrb.mxu1 %v598_v43 }
 0x11d   : > { %756 = vmatmul.f32.vlgmr.msrb.gmra.mxu1 %v594_v20 }
 0x170   : > { %v737_v48 = vpop.f32.mrf.mxu3 }
 0x174   : > { %v717_v47 = vpop.f32.mrf.mxu2 }
 0x175   : > { %v718_v50 = vadd.f32 %v717_v47, %v654_v44 }
 0x177   : > { %v738_v54 = vadd.f32 %v737_v48, %v718_v50 }
 0x178   : > { %v777_v57 = vpop.f32.mrf.mxu3 }
 0x179   : > { %v788_v61 = vmul.f32 %v1472_v55, %v738_v54 }
 0x17a   : > { %v697_v45 = vpop.f32.mrf.mxu1 }
 0x180   : > { %v677_v46 = vpop.f32.mrf.mxu0 }
 0x181   : > { %v678_v49 = vadd.f32 %v677_v46, %v654_v44 }
 0x183   : > { %v698_v52 = vadd.f32 %v697_v45, %v678_v49 }
 0x185   : > { %v787_v60 = vmul.f32 %v1470_v53, %v698_v52 }
 0x187   : > { %v790_v4 = vadd.f32 %v788_v61, %v787_v60 }
 0x19a   : > { %v757_v56 = vpop.f32.mrf.mxu1 }
 0x19b   : > { %v758_v58 = vadd.f32 %v757_v56, %v654_v44 }
 0x19d   : > { %v778_v62 = vadd.f32 %v777_v57, %v758_v58 }
 0x19f   : > { %v789_v63 = vmul.f32 %v1474_v59, %v778_v62 }
 0x1a1   : > { %v791_v5 = vsel %vm261_vm0, %v789_v63, 0.0 }
 0x1a2   : > { %v792_v6 = vadd.f32 %v791_v5, %v790_v4 }
 0x1a4   : > { %793 = vadd.xlane.f32.xlu1 %v792_v6 }
 0x217   : > { %v794_v8 = vpop.xlane.xlu1 %793 }
 0x218   : > { %v795_v9 = vmul.f32 0.00390625, %v794_v8 }
 0x21a   : > { %v796_v10 = vsub.f32 %v698_v52, %v795_v9  ;;  %v797_v11 = vsub.f32 %v738_v54, %v795_v9  ;;  %v798_v12 = vsub.f32 %v778_v62, %v795_v9 }
 0x21c   : > { %v799_v13 = vmul.f32 %v796_v10, %v796_v10  ;;  %v800_v14 = vmul.f32 %v797_v11, %v797_v11  ;;  %v801_v15 = vmul.f32 %v798_v12, %v798_v12 }
 0x21e   : > { %v802_v16 = vmul.f32 %v799_v13, %v1470_v53  ;;  %v803_v17 = vmul.f32 %v800_v14, %v1472_v55  ;;  %v804_v18 = vmul.f32 %v801_v15, %v1474_v59 }
 0x220   : > { %v805_v19 = vadd.f32 %v803_v17, %v802_v16  ;;  %v806_v20 = vsel %vm261_vm0, %v804_v18, 0.0  ;;  %v1028_v16 = vld [vmem:[%s1597_s4] sm:$0xff] }
 0x222   : > { %v807_v21 = vadd.f32 %v806_v20, %v805_v19 }
 0x224   : > { %808 = vadd.xlane.f32.xlu2 %v807_v21 }
 0x23c   : > { %923 = vrot.lane.b32.xlu2 %v1288_v7, %s1289_s19 }
 0x244   : > { %897 = vrot.lane.b32.xlu2 %v1288_v7, %s1290_s20 }
 0x24c   : > { %871 = vrot.lane.b32.xlu2 %v1288_v7, %s1291_s23 }
 0x297   : > { %v809_v22 = vpop.xlane.xlu2 %808 }
 0x298   : > { %v810_v23 = vmul.f32 0.00390625, %v809_v22 }
 0x29a   : > { %v811_v24 = vadd.f32 1e-05, %v810_v23  ;;  %v1056_v23 = vld [vmem:[%s1598_s5] sm:$0xff] }
 0x29c   : > { %1267 = vrsqrt.f32 %v811_v24  ;;  %vm818_vm12 = vweird.f32 %v811_v24 }
 0x29f   : > { %v924_v2 = vpop.permute.xlu2 %923 }
 0x2a2   : > { %v1268_v25 = vpop.eup %1267 }
 0x2a3   : > { %v813_v0 = vmul.f32 %v1268_v25, %v811_v24  ;;  %vm819_vm11 = vweird.f32 %v1268_v25 }
 0x2a4   : > { %vm820_vm13 = vmor %vm818_vm12, %vm819_vm11 }
 0x2a5   : > { %v814_v26 = vmul.f32 %v1268_v25, %v813_v0 }
 0x2a7   : > { %v815_v27 = vmul.f32 0.5, %v814_v26  ;;  %v898_v40 = vpop.permute.xlu2 %897 }
 0x2a9   : > { %v816_v1 = vsub.f32 1.5, %v815_v27 }
 0x2ab   : > { %v817_v28 = vmul.f32 %v1268_v25, %v816_v1 }
 0x2ad   : > { %v821_v29 = vsel %vm820_vm13, %v1268_v25, %v817_v28 }
 0x2ae   : > { %v822_v30 = vmul.f32 %v821_v29, %v796_v10  ;;  %v823_v31 = vmul.f32 %v821_v29, %v797_v11  ;;  %v824_v32 = vmul.f32 %v821_v29, %v798_v12 }
 0x2af   : > { %v872_v41 = vpop.permute.xlu2 %871 }
 0x2b0   : > { %v825_v33 = vmax.f32 %v822_v30, 0.0  ;;  %v826_v34 = vmax.f32 %v823_v31, 0.0  ;;  %v827_v35 = vmax.f32 %v824_v32, 0.0 }
 0x2b2   : > { %v1488_v36 = vmul.f32 %v825_v33, %v1470_v53  ;;  %v1491_v37 = vmul.f32 %v826_v34, %v1472_v55  ;;  %v830_v38 = vmul.f32 %v827_v35, %v1474_v59 }
 0x2b4   : > { %975 = vrot.lane.b32.xlu1 %v1491_v37, %s1292_s24  ;;  %1014 = vrot.lane.b32.xlu0 %v1488_v36, %s1282_s30  ;;  %836 = vst.msk [vmem:[#allocation3 + $0x18] sm:$0xff] %vm261_vm0, %v830_v38 }
 0x2b5   : > { %973 = vrot.lane.b32.xlu2 %v1488_v36, %s1292_s24 }
 0x2bb   : > { %v918_v39 = vld [vmem:[#allocation3 + $0x18] sm:$0xff] }
 0x2bc   : > { %1016 = vrot.lane.b32.xlu0 %v1491_v37, %s1282_s30  ;;  %925 = vrot.lane.b32.xlu1 %v1488_v36, %s1289_s19  ;;  %946 = vst.msk [vmem:[#allocation4 + $0x70] sm:$0xff] %vm261_vm0, %v918_v39 }
 0x2bd   : > { %845 = vrot.lane.b32.xlu2 %v1288_v7, %s1293_s25 }
 0x2c3   : > { %v1043_v1 = vld [vmem:[#allocation4 + $0x70] sm:$0xff] }
 0x2c4   : > { %994 = vrot.lane.b32.xlu0 %v1488_v36, %s1283_s7  ;;  %899 = vrot.lane.b32.xlu1 %v1488_v36, %s1290_s20 }
 0x2c5   : > { %901 = vrot.lane.b32.xlu2 %v1491_v37, %s1290_s20 }
 0x2cc   : > { %996 = vrot.lane.b32.xlu0 %v1491_v37, %s1283_s7  ;;  %873 = vrot.lane.b32.xlu1 %v1488_v36, %s1291_s23 }
 0x2cd   : > { %929 = vrot.lane.b32.xlu2 %v918_v39, %s1289_s19 }
 0x2d4   : > { %953 = vrot.lane.b32.xlu0 %v1488_v36, %s1286_s10  ;;  %847 = vrot.lane.b32.xlu1 %v1488_v36, %s1293_s25 }
 0x2d5   : > { %851 = vrot.lane.b32.xlu2 %v918_v39, %s1293_s25 }
 0x2dc   : > { %955 = vrot.lane.b32.xlu0 %v1491_v37, %s1286_s10  ;;  %875 = vrot.lane.b32.xlu1 %v1491_v37, %s1291_s23 }
 0x2e4   : > { %1018 = vrot.lane.b32.xlu0 %v918_v39, %s1282_s30  ;;  %903 = vrot.lane.b32.xlu1 %v918_v39, %s1290_s20  ;;  %s1241_s30 = smul.u32 24, %s1601_s22 }
 0x2e6   : > { %s251_s9 = scalar_lea.vmem %s1599_s6, %s1241_s30 }
 0x2ec   : > { %998 = vrot.lane.b32.xlu0 %v918_v39, %s1283_s7  ;;  %1059 = vperm.xlu1 %1266, %v1056_v23  }
 0x2f4   : > { %977 = vrot.lane.b32.xlu0 %v918_v39, %s1292_s24 }
 0x2fc   : > { %957 = vrot.lane.b32.xlu0 %v918_v39, %s1286_s10 }
 0x304   : > { %927 = vrot.lane.b32.xlu0 %v1491_v37, %s1289_s19 }
 0x30c   : > { %849 = vrot.lane.b32.xlu0 %v1491_v37, %s1293_s25 }
 0x30f   : > { %v974_v3 = vpop.permute.xlu2 %973 }
 0x314   : > { %877 = vrot.lane.b32.xlu0 %v918_v39, %s1291_s23 }
 0x317   : > { %v846_v45 = vpop.permute.xlu2 %845 }
 0x31f   : > { %v902_v50 = vpop.permute.xlu2 %901 }
 0x326   : > { %v976_v42 = vpop.permute.xlu1 %975  ;;  %v1015_v43 = vpop.permute.xlu0 %1014 }
 0x327   : > { %v980_v44 = vsel %vm979_vm14, %v974_v3, %v976_v42  ;;  %v930_v24 = vpop.permute.xlu2 %929 }
 0x32e   : > { %v1017_v46 = vpop.permute.xlu0 %1016  ;;  %v1531_v47 = vpop.permute.xlu1 %925 }
 0x32f   : > { %v1020_v48 = vsel %vm413_vm4, %v1015_v43, %v1017_v46  ;;  %v932_v49 = vsel %vm931_vm15, %v924_v2, %v1531_v47  ;;  %v852_v28 = vpop.permute.xlu2 %851 }
 0x330   : > { %1073 = vmatpush.msra.mxu3 %v1020_v48 }
 0x336   : > { %v995_v51 = vpop.permute.xlu0 %994  ;;  %v900_v52 = vpop.permute.xlu1 %899 }
 0x337   : > { %v906_v54 = vsel %vm905_vm1, %v898_v40, %v900_v52  ;;  %v907_v56 = vsel %vm905_vm1, %v900_v52, %v902_v50 }
 0x33e   : > { %v997_v57 = vpop.permute.xlu0 %996  ;;  %v874_v58 = vpop.permute.xlu1 %873 }
 0x33f   : > { %v1000_v60 = vsel %vm372_vm5, %v995_v51, %v997_v57  ;;  %v880_v61 = vsel %vm879_vm2, %v872_v41, %v874_v58 }
 0x340   : > { %1074 = vmatpush.msra.mxu3 %v1000_v60 }
 0x342   : > { %1075 = vmatpush.msra.mxu3 %v980_v44 }
 0x346   : > { %v954_v62 = vpop.permute.xlu0 %953  ;;  %v848_v63 = vpop.permute.xlu1 %847 }
 0x347   : > { %v854_v4 = vsel %vm853_vm3, %v846_v45, %v848_v63 }
 0x34e   : > { %v956_v5 = vpop.permute.xlu0 %955  ;;  %v1541_v6 = vpop.permute.xlu1 %875 }
 0x34f   : > { %v959_v7 = vsel %vm290_vm8, %v954_v62, %v956_v5  ;;  %v881_v8 = vsel %vm879_vm2, %v874_v58, %v1541_v6 }
 0x350   : > { %1076 = vmatpush.msra.mxu3 %v959_v7 }
 0x352   : > { %1077 = vmatpush.msra.mxu3 %v1488_v36 }
 0x354   : > { %1078 = vmatpush.msra.mxu3 %v932_v49 }
 0x356   : > { %v1019_v9 = vpop.permute.xlu0 %1018  ;;  %v904_v10 = vpop.permute.xlu1 %903  ;;  %1079 = vmatpush.msra.mxu3 %v906_v54 }
 0x357   : > { %v1021_v11 = vsel %vm413_vm4, %v1017_v46, %v1019_v9  ;;  %1027 = vst.msk [vmem:[#allocation4 + $0xd0] sm:$0xff] %vm261_vm0, %v1019_v9  ;;  %v908_v12 = vsel %vm905_vm1, %v902_v50, %v904_v10  ;;  %vm1062_vm4 = vcmask 588800  }
 0x358   : > { %1080 = vmatpush.msra.mxu3 %v880_v61  ;;  %914 = vst.msk [vmem:[#allocation4 + $0x40] sm:$0xff] %vm261_vm0, %v908_v12 }
 0x35a   : > { %1081 = vmatpush.msra.mxu3 %v854_v4 }
 0x35b   : > { %1235 = vmatmul.msk.f32.vlgmr.msra.gmra.mxu3 %vm1062_vm4, %v1028_v16 }
 0x35c   : > { %1093 = vmatpush.msrb.mxu3 %v1021_v11 }
 0x35e   : > { %v999_v13 = vpop.permute.xlu0 %998  ;;  %v1055_v14 = vld [vmem:[#allocation4 + $0xd0] sm:$0xff]  ;;  %v1060_v39 = vpop.permute.xlu1 %1059 }
 0x35f   : > { %v1001_v15 = vsel %vm372_vm5, %v997_v57, %v999_v13  ;;  %1007 = vst.msk [vmem:[#allocation4 + $0xb8] sm:$0xff] %vm261_vm0, %v999_v13  ;;  %1113 = vmatpush.msrb.mxu0 %v1055_v14  ;;  %v1037_v33 = vld [vmem:[#allocation4 + $0x40] sm:$0xff] }
 0x360   : > { %1094 = vmatpush.msrb.mxu3 %v1001_v15 }
 0x366   : > { %v978_v17 = vpop.permute.xlu0 %977  ;;  %v1052_v18 = vld [vmem:[#allocation4 + $0xb8] sm:$0xff] }
 0x367   : > { %v981_v19 = vsel %vm979_vm14, %v976_v42, %v978_v17  ;;  %987 = vst.msk [vmem:[#allocation4 + $0xa0] sm:$0xff] %vm261_vm0, %v978_v17  ;;  %1114 = vmatpush.msrb.mxu0 %v1052_v18 }
 0x368   : > { %1095 = vmatpush.msrb.mxu3 %v981_v19 }
 0x36e   : > { %v958_v20 = vpop.permute.xlu0 %957  ;;  %v1049_v21 = vld [vmem:[#allocation4 + $0xa0] sm:$0xff] }
 0x36f   : > { %v960_v22 = vsel %vm290_vm8, %v956_v5, %v958_v20  ;;  %966 = vst.msk [vmem:[#allocation4 + $0x88] sm:$0xff] %vm261_vm0, %v958_v20  ;;  %1115 = vmatpush.msrb.mxu0 %v1049_v21 }
 0x370   : > { %1096 = vmatpush.msrb.mxu3 %v960_v22 }
 0x372   : > { %1097 = vmatpush.msrb.mxu3 %v1491_v37 }
 0x376   : > { %v928_v25 = vpop.permute.xlu0 %927  ;;  %v1046_v0 = vld [vmem:[#allocation4 + $0x88] sm:$0xff] }
 0x377   : > { %v933_v26 = vsel %vm931_vm15, %v1531_v47, %v928_v25  ;;  %v934_v27 = vsel %vm931_vm15, %v928_v25, %v930_v24  ;;  %1116 = vmatpush.msrb.mxu0 %v1046_v0 }
 0x378   : > { %1098 = vmatpush.msrb.mxu3 %v933_v26  ;;  %940 = vst.msk [vmem:[#allocation4 + $0x58] sm:$0xff] %vm261_vm0, %v934_v27 }
 0x379   : > { %1117 = vmatpush.msrb.mxu0 %v1043_v1 }
 0x37a   : > { %1099 = vmatpush.msrb.mxu3 %v907_v56 }
 0x37c   : > { %1100 = vmatpush.msrb.mxu3 %v881_v8 }
 0x37e   : > { %v850_v29 = vpop.permute.xlu0 %849 }
 0x37f   : > { %v855_v30 = vsel %vm853_vm3, %v848_v63, %v850_v29  ;;  %v856_v31 = vsel %vm853_vm3, %v850_v29, %v852_v28  ;;  %v1040_v32 = vld [vmem:[#allocation4 + $0x58] sm:$0xff] }
 0x380   : > { %1101 = vmatpush.msrb.mxu3 %v855_v30  ;;  %862 = vst.msk [vmem:[#allocation4 + $0x10] sm:$0xff] %vm261_vm0, %v856_v31  ;;  %1118 = vmatpush.msrb.mxu0 %v1040_v32 }
 0x381   : > { %1236 = vmatmul.msk.f32.vlgmr.msrb.gmra.mxu3 %vm1062_vm4, %v1028_v16 }
 0x382   : > { %1119 = vmatpush.msrb.mxu0 %v1037_v33 }
 0x386   : > { %v878_v34 = vpop.permute.xlu0 %877 }
 0x387   : > { %v882_v35 = vsel %vm879_vm2, %v1541_v6, %v878_v34  ;;  %v1031_v37 = vld [vmem:[#allocation4 + $0x10] sm:$0xff] }
 0x388   : > { %888 = vst.msk [vmem:[#allocation4 + $0x28] sm:$0xff] %vm261_vm0, %v882_v35 }
 0x38f   : > { %v1034_v36 = vld [vmem:[#allocation4 + $0x28] sm:$0xff] }
 0x390   : > { %1120 = vmatpush.msrb.mxu0 %v1034_v36 }
 0x392   : > { %1121 = vmatpush.msrb.mxu0 %v1031_v37 }
 0x393   : > { %1237 = vmatmul.msk.f32.vlgmr.msrb.gmra.mxu0 %vm1062_vm4, %v1028_v16 }
 0x3de   : > { %v1083_v38 = vpop.f32.mrf.mxu3 }
 0x3df   : > { %v1084_v40 = vadd.f32 %v1083_v38, %v1060_v39 }
 0x3e1   : > { %v1126_v3 = vmul.f32 %v1084_v40, %v1470_v53 }
 0x404   : > { %v1103_v2 = vpop.f32.mrf.mxu3 }
 0x405   : > { %v1104_v41 = vadd.f32 %v1103_v2, %v1060_v39 }
 0x407   : > { %v1127_v42 = vmul.f32 %v1104_v41, %v1472_v55 }
 0x409   : > { %v1129_v46 = vadd.f32 %v1127_v42, %v1126_v3 }
 0x410   : > { %v1123_v43 = vpop.f32.mrf.mxu0 }
 0x411   : > { %v1124_v44 = vadd.f32 %v1123_v43, %v1060_v39 }
 0x413   : > { %v1128_v45 = vmul.f32 %v1124_v44, %v1474_v59 }
 0x415   : > { %v1130_v47 = vsel %vm261_vm0, %v1128_v45, 0.0 }
 0x416   : > { %v1131_v48 = vadd.f32 %v1130_v47, %v1129_v46 }
 0x418   : > { %1132 = vadd.xlane.f32.xlu0 %v1131_v48 }
 0x48b   : > { %v1133_v49 = vpop.xlane.xlu0 %1132 }
 0x48c   : > { %v1134_v50 = vmul.f32 0.00390625, %v1133_v49 }
 0x48e   : > { %v1135_v51 = vsub.f32 %v1084_v40, %v1134_v50  ;;  %v1136_v52 = vsub.f32 %v1104_v41, %v1134_v50  ;;  %v1137_v54 = vsub.f32 %v1124_v44, %v1134_v50 }
 0x490   : > { %v1138_v56 = vmul.f32 %v1135_v51, %v1135_v51  ;;  %v1139_v57 = vmul.f32 %v1136_v52, %v1136_v52  ;;  %v1140_v58 = vmul.f32 %v1137_v54, %v1137_v54 }
 0x492   : > { %v1141_v60 = vmul.f32 %v1138_v56, %v1470_v53  ;;  %v1142_v61 = vmul.f32 %v1139_v57, %v1472_v55  ;;  %v1143_v62 = vmul.f32 %v1140_v58, %v1474_v59 }
 0x494   : > { %v1144_v63 = vadd.f32 %v1142_v61, %v1141_v60  ;;  %v1145_v4 = vsel %vm261_vm0, %v1143_v62, 0.0 }
 0x496   : > { %v1146_v5 = vadd.f32 %v1145_v4, %v1144_v63 }
 0x498   : > { %1147 = vadd.xlane.f32.xlu2 %v1146_v5 }
 0x50b   : > { %v1148_v6 = vpop.xlane.xlu2 %1147 }
 0x50c   : > { %v1149_v7 = vmul.f32 0.00390625, %v1148_v6 }
 0x50e   : > { %v1150_v8 = vadd.f32 1e-05, %v1149_v7 }
 0x510   : > { %1269 = vrsqrt.f32 %v1150_v8  ;;  %vm1157_vm6 = vweird.f32 %v1150_v8 }
 0x516   : > { %v1270_v9 = vpop.eup %1269 }
 0x517   : > { %v1152_v10 = vmul.f32 %v1270_v9, %v1150_v8  ;;  %vm1158_vm5 = vweird.f32 %v1270_v9 }
 0x518   : > { %vm1159_vm7 = vmor %vm1157_vm6, %vm1158_vm5 }
 0x519   : > { %v1153_v11 = vmul.f32 %v1270_v9, %v1152_v10 }
 0x51b   : > { %v1154_v12 = vmul.f32 0.5, %v1153_v11 }
 0x51d   : > { %v1155_v13 = vsub.f32 1.5, %v1154_v12 }
 0x51f   : > { %v1156_v53 = vmul.f32 %v1270_v9, %v1155_v13 }
 0x521   : > { %v1160_v55 = vsel %vm1159_vm7, %v1270_v9, %v1156_v53 }
 0x522   : > { %v1161_v59 = vmul.f32 %v1160_v55, %v1135_v51  ;;  %v1162_v14 = vmul.f32 %v1160_v55, %v1136_v52  ;;  %v1163_v15 = vmul.f32 %v1160_v55, %v1137_v54 }
 0x524   : > { %v1164_v16 = vmax.f32 %v1161_v59, 0.0  ;;  %v1165_v17 = vmax.f32 %v1162_v14, 0.0  ;;  %v1166_v18 = vmax.f32 %v1163_v15, 0.0 }
 0x526   : > { %1167 = vst [vmem:[%s251_s9] sm:$0xff] %v1164_v16 }
 0x527   : > { %1168 = vst [vmem:[%s251_s9 + $0x8] sm:$0xff] %v1165_v17 }
 0x528   : > { %1169 = vst.msk [vmem:[%s251_s9 + $0x10] sm:$0xff] %vm261_vm0, %v1166_v18 }
 0x529 PF: > { %s16_s21 = sadd.s32 1, %s1277_s21  }
 0x52a   : > { %p13_p4 = scmp.ge.s32.totalorder %s16_s21, 4  }
 0x52c   :  { %15 = sbr.rel (!%p13_p4) target bundleno = 1 (0x1), region = 74 }

</bundles_post_ra>
